<compile_context>
chip_gen: v6e
topology: v6e:2x2x1
jax: 0.10.0
libtpu: 0.0.40
codegen_flags: <defaults>
</compile_context>

<pallas_src>
import jax
import jax.numpy as jnp
from jax import lax
from jax.experimental import pallas as pl
from jax.experimental.pallas import tpu as pltpu


def basic_block_kernel(x_ref, ml_ref, mr_ref, w1_ref, s1_ref, b1_ref,
                       w2_ref, s2_ref, b2_ref, out_ref):
    """One batch element per grid step (everything in folded NCHW layout).

    x_ref   : (1, Cin, H*W)        input image, lanes = flattened H*W
    ml_ref  : (1, (H+2)*W)  f32    0 where column index == 0   (left border)
    mr_ref  : (1, (H+2)*W)  f32    0 where column index == W-1 (right border)
    w*_ref  : (Cout, 9*C)   bf16   im2col-folded conv weight, (kh,kw,c) cols
    s*_ref  : (Cout, 1)     f32    folded BN scale
    b*_ref  : (Cout, 1)     f32    folded BN bias
    out_ref : (1, Cout, H*W)
    """
    HW = x_ref.shape[2]
    P = ml_ref.shape[1]              # (H + 2) * W
    W = (P - HW) // 2
    H = HW // W

    ml = ml_ref[...]                 # (1, P)
    mr = mr_ref[...]

    def conv3x3_bn(x_flat, w_mat, s, b):
        # x_flat: (C, H*W) f32; w_mat: (Cout, 9*C) bf16 -> (Cout, H*W) f32
        C = x_flat.shape[0]
        # H-halo: prepend/append one zero row (W lanes) -> (C, (H+2)*W).
        zrow = jnp.zeros((C, W), jnp.float32)
        xpf = jnp.concatenate([zrow, x_flat, zrow], axis=1)
        # W-halo: lane-shifted copies, masked at row boundaries.
        z1 = jnp.zeros((C, 1), jnp.float32)
        x_left = jnp.concatenate([z1, xpf[:, :P - 1]], axis=1) * ml   # kw = 0
        x_right = jnp.concatenate([xpf[:, 1:], z1], axis=1) * mr      # kw = 2
        taps = (x_left, xpf, x_right)                                 # index kw
        # im2col: 9 taps stacked on the sublane axis -> single MXU pass.
        cols = [taps[kw][:, kh * W: kh * W + HW]
                for kh in range(3) for kw in range(3)]
        xcol = jnp.concatenate(cols, axis=0).astype(jnp.bfloat16)     # (9C, HW)
        acc = jnp.dot(w_mat, xcol, preferred_element_type=jnp.float32)
        return acc * s + b                                            # (Cout, HW)

    x0 = x_ref[0].astype(jnp.float32)                                 # (Cin, HW)

    act1 = jnp.maximum(
        conv3x3_bn(x0, w1_ref[...], s1_ref[...], b1_ref[...]), 0.0)
    out2 = conv3x3_bn(act1, w2_ref[...], s2_ref[...], b2_ref[...])
    out_ref[0] = jnp.maximum(out2 + x0, 0.0).astype(out_ref.dtype)


def basic_block(x_nchw, params, eps=1e-5):
    """BasicBlock forward (stride=1, downsample=None). x_nchw: (N, C, H, W)."""
    (w1, g1, be1, rm1, rv1, w2, g2, be2, rm2, rv2) = params

    N, Cin, H, W = x_nchw.shape
    Cout = w1.shape[0]
    assert Cin == Cout, "stride=1 / downsample=None requires inplanes == planes"
    HW = H * W
    P = (H + 2) * W

    # Free reshape: NCHW is contiguous, so (N, C, H*W) is a bitcast view.
    x_in = x_nchw.reshape(N, Cin, HW)

    # Tiny glue: fold conv weights to im2col layout (bf16 MXU operands) and
    # fold BN running stats into per-channel scale/bias (f32).
    def fold_w(w):
        co, ci = w.shape[0], w.shape[1]
        return jnp.transpose(w, (0, 2, 3, 1)).reshape(co, 9 * ci).astype(jnp.bfloat16)

    def fold_bn(g, b, m, v):
        s = g / jnp.sqrt(v + eps)
        return (s.reshape(-1, 1).astype(jnp.float32),
                (b - m * s).reshape(-1, 1).astype(jnp.float32))

    w1m, w2m = fold_w(w1), fold_w(w2)
    s1, b1 = fold_bn(g1, be1, rm1, rv1)
    s2, b2 = fold_bn(g2, be2, rm2, rv2)

    # W-border masks for the folded layout (zero where a lane shift would
    # wrap across an image row).
    qw = jnp.arange(P, dtype=jnp.int32) % W
    mask_l = (qw != 0).astype(jnp.float32).reshape(1, P)
    mask_r = (qw != W - 1).astype(jnp.float32).reshape(1, P)

    out_flat = pl.pallas_call(
        basic_block_kernel,
        out_shape=jax.ShapeDtypeStruct((N, Cout, HW), x_nchw.dtype),
        grid_spec=pltpu.PrefetchScalarGridSpec(
            num_scalar_prefetch=0,
            grid=(N,),
            in_specs=[
                pl.BlockSpec((1, Cin, HW), lambda n: (n, 0, 0)),
                pl.BlockSpec((1, P), lambda n: (0, 0)),
                pl.BlockSpec((1, P), lambda n: (0, 0)),
                pl.BlockSpec((Cout, 9 * Cin), lambda n: (0, 0)),
                pl.BlockSpec((Cout, 1), lambda n: (0, 0)),
                pl.BlockSpec((Cout, 1), lambda n: (0, 0)),
                pl.BlockSpec((Cout, 9 * Cout), lambda n: (0, 0)),
                pl.BlockSpec((Cout, 1), lambda n: (0, 0)),
                pl.BlockSpec((Cout, 1), lambda n: (0, 0)),
            ],
            out_specs=pl.BlockSpec((1, Cout, HW), lambda n: (n, 0, 0)),
        ),
        compiler_params=pltpu.CompilerParams(
            dimension_semantics=("parallel",),
            vmem_limit_bytes=64 * 1024 * 1024),
    )(x_in, mask_l, mask_r, w1m, s1, b1, w2m, s2, b2)

    return out_flat.reshape(N, Cout, H, W)


def _reference(x_nchw, params, eps=1e-5):
    """Pure-JAX f32 reference (eval-mode BN), NCHW in/out."""
    (w1, g1, be1, rm1, rv1, w2, g2, be2, rm2, rv2) = params

    def conv3x3(x, w):
        return lax.conv_general_dilated(
            x, w, window_strides=(1, 1), padding=((1, 1), (1, 1)),
            dimension_numbers=('NCHW', 'OIHW', 'NCHW'))

    def bn(x, g, b, m, v):
        sc = (g / jnp.sqrt(v + eps)).reshape(1, -1, 1, 1)
        bi = (b - m * g / jnp.sqrt(v + eps)).reshape(1, -1, 1, 1)
        return x * sc + bi

    out = jnp.maximum(bn(conv3x3(x_nchw, w1), g1, be1, rm1, rv1), 0.0)
    out = bn(conv3x3(out, w2), g2, be2, rm2, rv2)
    return jnp.maximum(out + x_nchw, 0.0)


if __name__ == "__main__":
    key = jax.random.PRNGKey(0)
    N, C, H, W = 2, 8, 16, 16        # inplanes = planes = 8, stride = 1
    ks = jax.random.split(key, 11)

    x = jax.random.normal(ks[0], (N, C, H, W), jnp.float32)

    w1 = jax.random.normal(ks[1], (C, C, 3, 3), jnp.float32) * 0.1
    g1 = 1.0 + 0.1 * jax.random.normal(ks[2], (C,), jnp.float32)
    be1 = 0.1 * jax.random.normal(ks[3], (C,), jnp.float32)
    rm1 = 0.1 * jax.random.normal(ks[4], (C,), jnp.float32)
    rv1 = 0.5 + jax.random.uniform(ks[5], (C,), jnp.float32)

    w2 = jax.random.normal(ks[6], (C, C, 3, 3), jnp.float32) * 0.1
    g2 = 1.0 + 0.1 * jax.random.normal(ks[7], (C,), jnp.float32)
    be2 = 0.1 * jax.random.normal(ks[8], (C,), jnp.float32)
    rm2 = 0.1 * jax.random.normal(ks[9], (C,), jnp.float32)
    rv2 = 0.5 + jax.random.uniform(ks[10], (C,), jnp.float32)

    params = (w1, g1, be1, rm1, rv1, w2, g2, be2, rm2, rv2)

    out = jax.block_until_ready(basic_block(x, params))
    ref = jax.block_until_ready(_reference(x, params))

    assert out.shape == (N, C, H, W)
    # bf16 MXU operands -> loosened tolerance vs. the f32 reference
    # (structural bugs would show up as O(1) errors, well above this).
    err = jnp.max(jnp.abs(out - ref))
    assert jnp.allclose(out, ref, atol=5e-2, rtol=5e-2), f"max err {err}"
    print("KERNEL_OK")
</pallas_src>

<mosaic_0001>
module attributes {stable_mosaic.version = 11 : i64} {
  func.func @basic_block_kernel(%arg0: i32, %arg1: memref<1x8x256xf32, #tpu.memory_space<vmem>>, %arg2: memref<1x288xf32, #tpu.memory_space<vmem>>, %arg3: memref<1x288xf32, #tpu.memory_space<vmem>>, %arg4: memref<8x72xbf16, #tpu.memory_space<vmem>>, %arg5: memref<8x1xf32, #tpu.memory_space<vmem>>, %arg6: memref<8x1xf32, #tpu.memory_space<vmem>>, %arg7: memref<8x72xbf16, #tpu.memory_space<vmem>>, %arg8: memref<8x1xf32, #tpu.memory_space<vmem>>, %arg9: memref<8x1xf32, #tpu.memory_space<vmem>>, %arg10: memref<1x8x256xf32, #tpu.memory_space<vmem>>) attributes {dimension_semantics = [#tpu.dimension_semantics<parallel>], iteration_bounds = array<i64: 2>, scalar_prefetch = 0 : i64, scratch_operands = 0 : i64, tpu.core_type = #tpu.core_type<tc>, window_params = [{transform_indices = @transform_0, window_bounds = array<i64: 1, 8, 256>}, {pipeline_mode = #tpu.pipeline_mode<synchronous>, transform_indices = @transform_1, window_bounds = array<i64: 1, 288>}, {pipeline_mode = #tpu.pipeline_mode<synchronous>, transform_indices = @transform_2, window_bounds = array<i64: 1, 288>}, {pipeline_mode = #tpu.pipeline_mode<synchronous>, transform_indices = @transform_3, window_bounds = array<i64: 8, 72>}, {pipeline_mode = #tpu.pipeline_mode<synchronous>, transform_indices = @transform_4, window_bounds = array<i64: 8, 1>}, {pipeline_mode = #tpu.pipeline_mode<synchronous>, transform_indices = @transform_5, window_bounds = array<i64: 8, 1>}, {pipeline_mode = #tpu.pipeline_mode<synchronous>, transform_indices = @transform_6, window_bounds = array<i64: 8, 72>}, {pipeline_mode = #tpu.pipeline_mode<synchronous>, transform_indices = @transform_7, window_bounds = array<i64: 8, 1>}, {pipeline_mode = #tpu.pipeline_mode<synchronous>, transform_indices = @transform_8, window_bounds = array<i64: 8, 1>}, {transform_indices = @transform_9, window_bounds = array<i64: 1, 8, 256>}]} {
    %c0 = arith.constant 0 : index
    %c0_0 = arith.constant 0 : index
    %0 = vector.load %arg2[%c0, %c0_0] : memref<1x288xf32, #tpu.memory_space<vmem>>, vector<1x288xf32>
    %c0_1 = arith.constant 0 : index
    %c0_2 = arith.constant 0 : index
    %1 = vector.load %arg3[%c0_1, %c0_2] : memref<1x288xf32, #tpu.memory_space<vmem>>, vector<1x288xf32>
    %c0_3 = arith.constant 0 : index
    %c0_4 = arith.constant 0 : index
    %c0_5 = arith.constant 0 : index
    %2 = vector.load %arg1[%c0_3, %c0_4, %c0_5] : memref<1x8x256xf32, #tpu.memory_space<vmem>>, vector<1x8x256xf32>
    %3 = vector.shape_cast %2 : vector<1x8x256xf32> to vector<8x256xf32>
    %c0_6 = arith.constant 0 : index
    %c0_7 = arith.constant 0 : index
    %4 = vector.load %arg4[%c0_6, %c0_7] : memref<8x72xbf16, #tpu.memory_space<vmem>>, vector<8x72xbf16>
    %c0_8 = arith.constant 0 : index
    %c0_9 = arith.constant 0 : index
    %5 = vector.load %arg5[%c0_8, %c0_9] : memref<8x1xf32, #tpu.memory_space<vmem>>, vector<8x1xf32>
    %c0_10 = arith.constant 0 : index
    %c0_11 = arith.constant 0 : index
    %6 = vector.load %arg6[%c0_10, %c0_11] : memref<8x1xf32, #tpu.memory_space<vmem>>, vector<8x1xf32>
    %cst = arith.constant 0.000000e+00 : f32
    %7 = vector.broadcast %cst : f32 to vector<8x16xf32>
    %8 = tpu.concatenate %7, %3, %7 in 1 : vector<8x16xf32>, vector<8x256xf32>, vector<8x16xf32> -> vector<8x288xf32>
    %cst_12 = arith.constant 0.000000e+00 : f32
    %9 = vector.broadcast %cst_12 : f32 to vector<8x1xf32>
    %10 = vector.extract_strided_slice %8 {offsets = [0, 0], sizes = [8, 287], strides = [1, 1]} : vector<8x288xf32> to vector<8x287xf32>
    %11 = tpu.concatenate %9, %10 in 1 : vector<8x1xf32>, vector<8x287xf32> -> vector<8x288xf32>
    %12 = vector.broadcast %0 : vector<1x288xf32> to vector<8x288xf32>
    %13 = arith.mulf %11, %12 : vector<8x288xf32>
    %14 = vector.extract_strided_slice %8 {offsets = [0, 1], sizes = [8, 287], strides = [1, 1]} : vector<8x288xf32> to vector<8x287xf32>
    %15 = tpu.concatenate %14, %9 in 1 : vector<8x287xf32>, vector<8x1xf32> -> vector<8x288xf32>
    %16 = vector.broadcast %1 : vector<1x288xf32> to vector<8x288xf32>
    %17 = arith.mulf %15, %16 : vector<8x288xf32>
    %18 = vector.extract_strided_slice %13 {offsets = [0, 0], sizes = [8, 256], strides = [1, 1]} : vector<8x288xf32> to vector<8x256xf32>
    %19 = vector.extract_strided_slice %8 {offsets = [0, 0], sizes = [8, 256], strides = [1, 1]} : vector<8x288xf32> to vector<8x256xf32>
    %20 = vector.extract_strided_slice %17 {offsets = [0, 0], sizes = [8, 256], strides = [1, 1]} : vector<8x288xf32> to vector<8x256xf32>
    %21 = vector.extract_strided_slice %13 {offsets = [0, 16], sizes = [8, 256], strides = [1, 1]} : vector<8x288xf32> to vector<8x256xf32>
    %22 = vector.extract_strided_slice %8 {offsets = [0, 16], sizes = [8, 256], strides = [1, 1]} : vector<8x288xf32> to vector<8x256xf32>
    %23 = vector.extract_strided_slice %17 {offsets = [0, 16], sizes = [8, 256], strides = [1, 1]} : vector<8x288xf32> to vector<8x256xf32>
    %24 = vector.extract_strided_slice %13 {offsets = [0, 32], sizes = [8, 256], strides = [1, 1]} : vector<8x288xf32> to vector<8x256xf32>
    %25 = vector.extract_strided_slice %8 {offsets = [0, 32], sizes = [8, 256], strides = [1, 1]} : vector<8x288xf32> to vector<8x256xf32>
    %26 = vector.extract_strided_slice %17 {offsets = [0, 32], sizes = [8, 256], strides = [1, 1]} : vector<8x288xf32> to vector<8x256xf32>
    %27 = tpu.concatenate %18, %19, %20, %21, %22, %23, %24, %25, %26 in 0 : vector<8x256xf32>, vector<8x256xf32>, vector<8x256xf32>, vector<8x256xf32>, vector<8x256xf32>, vector<8x256xf32>, vector<8x256xf32>, vector<8x256xf32>, vector<8x256xf32> -> vector<72x256xf32>
    %28 = arith.truncf %27 : vector<72x256xf32> to vector<72x256xbf16>
    %cst_13 = arith.constant dense<0.000000e+00> : vector<8x256xf32>
    %29 = tpu.matmul %4, %28, %cst_13 {dimension_numbers = #tpu.dot_dimension_numbers<[1], [0], [0], [1], [0, 0, 1, 1], [], []>} : vector<8x72xbf16>, vector<72x256xbf16>, vector<8x256xf32> -> vector<8x256xf32>
    %30 = vector.broadcast %5 : vector<8x1xf32> to vector<8x256xf32>
    %31 = arith.mulf %29, %30 : vector<8x256xf32>
    %32 = vector.broadcast %6 : vector<8x1xf32> to vector<8x256xf32>
    %33 = arith.addf %31, %32 : vector<8x256xf32>
    %cst_14 = arith.constant 0.000000e+00 : f32
    %34 = vector.broadcast %cst_14 : f32 to vector<8x256xf32>
    %35 = arith.maximumf %33, %34 : vector<8x256xf32>
    %c0_15 = arith.constant 0 : index
    %c0_16 = arith.constant 0 : index
    %36 = vector.load %arg7[%c0_15, %c0_16] : memref<8x72xbf16, #tpu.memory_space<vmem>>, vector<8x72xbf16>
    %c0_17 = arith.constant 0 : index
    %c0_18 = arith.constant 0 : index
    %37 = vector.load %arg8[%c0_17, %c0_18] : memref<8x1xf32, #tpu.memory_space<vmem>>, vector<8x1xf32>
    %c0_19 = arith.constant 0 : index
    %c0_20 = arith.constant 0 : index
    %38 = vector.load %arg9[%c0_19, %c0_20] : memref<8x1xf32, #tpu.memory_space<vmem>>, vector<8x1xf32>
    %cst_21 = arith.constant 0.000000e+00 : f32
    %39 = vector.broadcast %cst_21 : f32 to vector<8x16xf32>
    %40 = tpu.concatenate %39, %35, %39 in 1 : vector<8x16xf32>, vector<8x256xf32>, vector<8x16xf32> -> vector<8x288xf32>
    %cst_22 = arith.constant 0.000000e+00 : f32
    %41 = vector.broadcast %cst_22 : f32 to vector<8x1xf32>
    %42 = vector.extract_strided_slice %40 {offsets = [0, 0], sizes = [8, 287], strides = [1, 1]} : vector<8x288xf32> to vector<8x287xf32>
    %43 = tpu.concatenate %41, %42 in 1 : vector<8x1xf32>, vector<8x287xf32> -> vector<8x288xf32>
    %44 = vector.broadcast %0 : vector<1x288xf32> to vector<8x288xf32>
    %45 = arith.mulf %43, %44 : vector<8x288xf32>
    %46 = vector.extract_strided_slice %40 {offsets = [0, 1], sizes = [8, 287], strides = [1, 1]} : vector<8x288xf32> to vector<8x287xf32>
    %47 = tpu.concatenate %46, %41 in 1 : vector<8x287xf32>, vector<8x1xf32> -> vector<8x288xf32>
    %48 = vector.broadcast %1 : vector<1x288xf32> to vector<8x288xf32>
    %49 = arith.mulf %47, %48 : vector<8x288xf32>
    %50 = vector.extract_strided_slice %45 {offsets = [0, 0], sizes = [8, 256], strides = [1, 1]} : vector<8x288xf32> to vector<8x256xf32>
    %51 = vector.extract_strided_slice %40 {offsets = [0, 0], sizes = [8, 256], strides = [1, 1]} : vector<8x288xf32> to vector<8x256xf32>
    %52 = vector.extract_strided_slice %49 {offsets = [0, 0], sizes = [8, 256], strides = [1, 1]} : vector<8x288xf32> to vector<8x256xf32>
    %53 = vector.extract_strided_slice %45 {offsets = [0, 16], sizes = [8, 256], strides = [1, 1]} : vector<8x288xf32> to vector<8x256xf32>
    %54 = vector.extract_strided_slice %40 {offsets = [0, 16], sizes = [8, 256], strides = [1, 1]} : vector<8x288xf32> to vector<8x256xf32>
    %55 = vector.extract_strided_slice %49 {offsets = [0, 16], sizes = [8, 256], strides = [1, 1]} : vector<8x288xf32> to vector<8x256xf32>
    %56 = vector.extract_strided_slice %45 {offsets = [0, 32], sizes = [8, 256], strides = [1, 1]} : vector<8x288xf32> to vector<8x256xf32>
    %57 = vector.extract_strided_slice %40 {offsets = [0, 32], sizes = [8, 256], strides = [1, 1]} : vector<8x288xf32> to vector<8x256xf32>
    %58 = vector.extract_strided_slice %49 {offsets = [0, 32], sizes = [8, 256], strides = [1, 1]} : vector<8x288xf32> to vector<8x256xf32>
    %59 = tpu.concatenate %50, %51, %52, %53, %54, %55, %56, %57, %58 in 0 : vector<8x256xf32>, vector<8x256xf32>, vector<8x256xf32>, vector<8x256xf32>, vector<8x256xf32>, vector<8x256xf32>, vector<8x256xf32>, vector<8x256xf32>, vector<8x256xf32> -> vector<72x256xf32>
    %60 = arith.truncf %59 : vector<72x256xf32> to vector<72x256xbf16>
    %cst_23 = arith.constant dense<0.000000e+00> : vector<8x256xf32>
    %61 = tpu.matmul %36, %60, %cst_23 {dimension_numbers = #tpu.dot_dimension_numbers<[1], [0], [0], [1], [0, 0, 1, 1], [], []>} : vector<8x72xbf16>, vector<72x256xbf16>, vector<8x256xf32> -> vector<8x256xf32>
    %62 = vector.broadcast %37 : vector<8x1xf32> to vector<8x256xf32>
    %63 = arith.mulf %61, %62 : vector<8x256xf32>
    %64 = vector.broadcast %38 : vector<8x1xf32> to vector<8x256xf32>
    %65 = arith.addf %63, %64 : vector<8x256xf32>
    %66 = arith.addf %65, %3 : vector<8x256xf32>
    %cst_24 = arith.constant 0.000000e+00 : f32
    %67 = vector.broadcast %cst_24 : f32 to vector<8x256xf32>
    %68 = arith.maximumf %66, %67 : vector<8x256xf32>
    %c0_25 = arith.constant 0 : index
    %c0_26 = arith.constant 0 : index
    %c0_27 = arith.constant 0 : index
    %69 = vector.load %arg10[%c0_25, %c0_26, %c0_27] : memref<1x8x256xf32, #tpu.memory_space<vmem>>, vector<1x8x256xf32>
    %70 = vector.shape_cast %69 : vector<1x8x256xf32> to vector<8x256xf32>
    %71 = vector.shape_cast %68 : vector<8x256xf32> to vector<1x8x256xf32>
    tpu.vector_store %arg10[%c0_25, %c0_26, %c0_27], %71 {strides = array<i32>} : memref<1x8x256xf32, #tpu.memory_space<vmem>>, vector<1x8x256xf32>,
    return
  }
  func.func @transform_0(%arg0: i32) -> (i32, i32, i32) {
    %c0_i32 = arith.constant 0 : i32
    %c0_i32_0 = arith.constant 0 : i32
    %c0_i32_1 = arith.constant 0 : i32
    return %arg0, %c0_i32, %c0_i32_0 : i32, i32, i32
  }
  func.func @transform_1(%arg0: i32) -> (i32, i32) {
    %c0_i32 = arith.constant 0 : i32
    %c0_i32_0 = arith.constant 0 : i32
    %c0_i32_1 = arith.constant 0 : i32
    return %c0_i32, %c0_i32_0 : i32, i32
  }
  func.func @transform_2(%arg0: i32) -> (i32, i32) {
    %c0_i32 = arith.constant 0 : i32
    %c0_i32_0 = arith.constant 0 : i32
    %c0_i32_1 = arith.constant 0 : i32
    return %c0_i32, %c0_i32_0 : i32, i32
  }
  func.func @transform_3(%arg0: i32) -> (i32, i32) {
    %c0_i32 = arith.constant 0 : i32
    %c0_i32_0 = arith.constant 0 : i32
    %c0_i32_1 = arith.constant 0 : i32
    return %c0_i32, %c0_i32_0 : i32, i32
  }
  func.func @transform_4(%arg0: i32) -> (i32, i32) {
    %c0_i32 = arith.constant 0 : i32
    %c0_i32_0 = arith.constant 0 : i32
    %c0_i32_1 = arith.constant 0 : i32
    return %c0_i32, %c0_i32_0 : i32, i32
  }
  func.func @transform_5(%arg0: i32) -> (i32, i32) {
    %c0_i32 = arith.constant 0 : i32
    %c0_i32_0 = arith.constant 0 : i32
    %c0_i32_1 = arith.constant 0 : i32
    return %c0_i32, %c0_i32_0 : i32, i32
  }
  func.func @transform_6(%arg0: i32) -> (i32, i32) {
    %c0_i32 = arith.constant 0 : i32
    %c0_i32_0 = arith.constant 0 : i32
    %c0_i32_1 = arith.constant 0 : i32
    return %c0_i32, %c0_i32_0 : i32, i32
  }
  func.func @transform_7(%arg0: i32) -> (i32, i32) {
    %c0_i32 = arith.constant 0 : i32
    %c0_i32_0 = arith.constant 0 : i32
    %c0_i32_1 = arith.constant 0 : i32
    return %c0_i32, %c0_i32_0 : i32, i32
  }
  func.func @transform_8(%arg0: i32) -> (i32, i32) {
    %c0_i32 = arith.constant 0 : i32
    %c0_i32_0 = arith.constant 0 : i32
    %c0_i32_1 = arith.constant 0 : i32
    return %c0_i32, %c0_i32_0 : i32, i32
  }
  func.func @transform_9(%arg0: i32) -> (i32, i32, i32) {
    %c0_i32 = arith.constant 0 : i32
    %c0_i32_0 = arith.constant 0 : i32
    %c0_i32_1 = arith.constant 0 : i32
    return %arg0, %c0_i32, %c0_i32_0 : i32, i32, i32
  }
}

</mosaic_0001>

<bundles_post_ra>
// kernel: tpu_custom_call.1
= control target key start
LH: loop header
LB: loop body
LE: loop exit
PB: predicated region body
PF: predicated region fallthrough
CT: control target
= control target key end

     0   :  { %14 = vsyncpa [#allocation3], 0  ;;  %s1582_s0 = inlined_call_operand.vmem [shape: f32[2,8,256], index: 0, kind: input, shape index: {}]   ;;  %s1583_s1 = inlined_call_operand.hbm [shape: f32[1,288], index: 1, kind: input, shape index: {}]   ;;  %s1584_s2 = inlined_call_operand.hbm [shape: f32[1,288], index: 2, kind: input, shape index: {}]   ;;  %s1585_s3 = inlined_call_operand.vmem [shape: bf16[8,72], index: 3, kind: input, shape index: {}]   ;;  %s1586_s4 = inlined_call_operand.vmem [shape: f32[8,1], index: 4, kind: input, shape index: {}]   ;;  %s1587_s5 = inlined_call_operand.vmem [shape: f32[8,1], index: 5, kind: input, shape index: {}]   ;;  %s1588_s6 = inlined_call_operand.vmem [shape: bf16[8,72], index: 6, kind: input, shape index: {}]   ;;  %s1589_s7 = inlined_call_operand.vmem [shape: f32[8,1], index: 7, kind: input, shape index: {}]   ;;  %s1590_s8 = inlined_call_operand.vmem [shape: f32[8,1], index: 8, kind: input, shape index: {}]   ;;  %s1591_s9 = inlined_call_operand.hbm [shape: f32[2,8,256], index: 9, kind: output, shape index: {}]  }
   0x1   :  { %15 = vsyncpa [#allocation6], 0 }
   0x2   :  { %16 = vsyncpa [#allocation4], 0 }
   0x3   :  { %18 = vsyncpa [#allocation4 + $0x1], 0  ;;  %s1241_s30 = smov 0   ;;  %s1243_s10 = smov 0  }
   0x4   :  { %s1245_s11 = smov 0   ;;  %s1247_s12 = smov 0  }
   0x5 LB: > { %s1262_s13 = sadd.s32 4294967295, %s1179_s12   ;;  %s880_s14 = sadd.s32 4294967294, %s1179_s12   ;;  %s1179_s12 = sphi %s1247_s12, %s1609_s12   ;;  %s1175_s11 = sphi %s1245_s11, %s1608_s11   ;;  %s1171_s10 = sphi %s1243_s10, %s1607_s10   ;;  %s1167_s30 = sphi %s1241_s30, %s1606_s30  }
   0x6   : > { %s1266_s15 = sadd.s32 1, %s1179_s12   ;;  %s225_s16 = sadd.s32 1, %s1175_s11 }
   0x7   : > { %s222_s17 = ssub.s32 %s1179_s12, %s1266_s15  ;;  %p235_p0 = scmp.ne.s32.totalorder %s1175_s11, %s1171_s10 }
   0x8   : > { %p223_p1 = scmp.eq.s32.totalorder %s222_s17, 0  ;;  %p236_p2 = scmp.eq.s32.totalorder %s1262_s13, 1 }
   0x9   : > { %p241_p3 = scmp.ne.s32.totalorder %s1171_s10, %s1167_s30  ;;  %p242_p4 = scmp.eq.s32.totalorder %s880_s14, 1 }
   0xa   : > { %s1277_s18 = scalar_select %p223_p1, %s1175_s11, %s225_s16  }
   0xb   : > { %p1279_p5 = por %p236_p2, %p235_p0  ;;  %p1283_p6 = por %p242_p4, %p241_p3 }
   0xc   : > { %p881_p7 = scmp.ge.s32.totalorder %s1179_s12, 1  ;;  %p249_p8 = scmp.lt.s32.totalorder %s1179_s12, 3 }
   0xd   : > { %s1594_s19 = scalar_select %p1279_p5, 1, 0 }
   0xe   : > { %s1595_s20 = scalar_select %p1283_p6, 1, 0 }
   0xf   : > { %p1592_p9 = scmp.eq.s32.totalorder %s1262_s13, 0  ;;  %p1290_p10 = pnand %p881_p7, %p249_p8 }
  0x10   : > { %s1181_s22 = smov [#allocation2]   ;;  %s1182_s24 = smov [#allocation5]  }
  0x11   : > { %s262_s23 = sshll.u32 %s1181_s22, 4  ;;  %p920_p11 = pneg %p1290_p10  ;;  %s263_s23 = int_to_ptr.vmem [resolvable:$true] %s262_s23 }
  0x12   : > { %s273_s25 = sshll.u32 %s1182_s24, 4  ;;  %s1070_s27 = scalar_lea.vmem %s263_s23, 48  ;;  %s274_s25 = int_to_ptr.vmem [resolvable:$true] %s273_s25 }
  0x13   : > { %p1298_p12 = pnand %p1592_p9, %p920_p11  ;;  %p1071_p0 = scmp.ne.s32.totalorder %s263_s23, %s1070_s27 }
  0x14   : > { %s1077_s28 = scalar_lea.vmem %s263_s23, 64  ;;  %p1078_p3 = scmp.lt.s32.totalorder %s263_s23, %s263_s23 }
  0x15   : > { %p1061_p13 = pneg %p1298_p12  ;;  %p1079_p4 = scmp.lt.s32.totalorder %s1077_s28, %s1070_s27 }
  0x17   : > { %p1073_p1 = pnand %p1071_p0, %p1061_p13  ;;  %p1080_p7 = por %p1079_p4, %p1078_p3 }
  0x19   : > { %p1074_p2 = pneg %p1073_p1 }
  0x1b   : > { %p1081_p8 = pnand %p1080_p7, %p1074_p2 }
  0x1d   : > { %1084 = shalt.err (!%p1081_p8)
}
  0x1e   : > { %923 = dma.hbm_to_vmem [thread:$0]  (!%p1298_p12), %s1583_s1, 48, %s263_s23, [#allocation3]  }
  0x1f   : > { %s1096_s16 = scalar_lea.vmem %s274_s25, 48  ;;  %s1103_s17 = scalar_lea.vmem %s274_s25, 64 }
  0x20   : > { %p1097_p11 = scmp.ne.s32.totalorder %s274_s25, %s1096_s16  ;;  %p1104_p1 = scmp.lt.s32.totalorder %s274_s25, %s274_s25 }
  0x21   : > { %p1105_p6 = scmp.lt.s32.totalorder %s1103_s17, %s1096_s16 }
  0x22   : > { %p1099_p9 = pnand %p1097_p11, %p1061_p13 }
  0x23   : > { %p1106_p5 = por %p1105_p6, %p1104_p1 }
  0x24   : > { %p1100_p0 = pneg %p1099_p9 }
  0x26   : > { %p1107_p3 = pnand %p1106_p5, %p1100_p0 }
  0x28   : > { %1110 = shalt.err (!%p1107_p3)
}
  0x29   : > { %926 = dma.hbm_to_vmem [thread:$0]  (!%p1298_p12), %s1584_s2, 48, %s274_s25, [#allocation6]  }
  0x2a   : > { %312 = sbr.rel (%p1290_p10) target bundleno = 1247 (0x4df), region = 56  ;;  %p1598_p2 = scmp.eq.s32.totalorder (!%p1290_p10), %s1262_s13, 0 }
  0x2f   : > { %1154 = dma.done.wait (%p1598_p2), [#allocation3], 48   ;;  %p1599_p9 = pmov %p1598_p2 }
  0x30   : > { %p1600_p13 = pmov %p1598_p2 }
  0x31   : > { %1156 = vsyncadd (%p1599_p9), [#allocation3], 4294967248 }
  0x32   : > { %1158 = dma.done.wait (%p1600_p13), [#allocation6], 48   ;;  %p1601_p5 = pmov %p1598_p2 }
  0x33   : > { %p352_p6 = scmp.lt.s32.totalorder %s1262_s13, 1  ;;  %s1183_s28 = smov 16   ;;  %vm371_vm0 = vcmask 130048   ;;  %v394_v7 = vlaneseq  ;;  %v359_v11 = vld [vmem:[#allocation5] sm:$0x7]  ;;  %vm418_vm1 = vcmask 1039360  }
  0x34   : > { %1160 = vsyncadd (%p1601_p5), [#allocation6], 4294967248  ;;  %s1184_s29 = smov 127   ;;  %s1185_s14 = smov 1   ;;  %v358_v16 = vld [vmem:[#allocation2] sm:$0x7] }
  0x35   : > { %s353_s23 = scalar_select %p352_p6, %s1262_s13, 1  ;;  %v395_v8 = vshrl.u32 %v394_v7, 7  ;;  %vm424_vm2 = vcmask 252928   ;;  %vm386_vm3 = vcmask 7168   ;;  %v1188_v46 = vmov 0   ;;  %v363_v47 = vld [vmem:[%s1586_s4] sm:$0xff]  ;;  %vm892_vm7 = vmneg %vm371_vm0 }
  0x36   : > { %s1186_s16 = smov 96   ;;  %s1187_s17 = smov 112   ;;  %566 = vmatprep.mubr.bf16.mxu0 %v1188_v46  ;;  %1017 = vset.pattern.permute.xlu0 %v1188_v46  ;;  %v364_v48 = vld [vmem:[%s1587_s5] sm:$0xff]  ;;  %vm488_vm4 = vcmask 785408   ;;  %vm527_vm5 = vcmask 1043456   ;;  %vm454_vm6 = vcmask 916480  }
  0x37   : > { %s908_s25 = sshll.u32 %s353_s23, 4  ;;  %v396_v9 = vsub.s32 0, %v395_v8  ;;  %v400_v10 = vsub.s32 1, %v395_v8  ;;  %v404_v13 = vsub.s32 2, %v395_v8  ;;  %1018 = vset.pattern.permute.xlu1 %v1188_v46  ;;  %755 = vmatprep.mubr.bf16.mxu1 %v1188_v46  ;;  %vm1189_vm8 = vmmov 1   ;;  %s349_s22 = sand.u32 1, %s1171_s10  }
  0x38   : > { %s356_s27 = scalar_lea.vmem %s1582_s0, %s908_s25  ;;  %vm1443_vm9 = vmpackc.low %vm892_vm7, %vm1189_vm8  ;;  %vm523_vm10 = vcmask 588800   ;;  %s888_s24 = sshll.u32 %s349_s22, 4 }
  0x39   : > { %v1335_v0 = vld [vmem:[%s356_s27] sm:$0xff]  ;;  %v1339_v1 = vld [vmem:[%s356_s27 + $0x8] sm:$0xff]  ;;  %v1366_v14 = vrot.slane %v359_v11, %v396_v9  ;;  %v1368_v15 = vrot.slane %v359_v11, %v400_v10  ;;  %v1370_v19 = vrot.slane %v359_v11, %v404_v13  ;;  %v1380_v24 = vrot.slane %v358_v16, %v400_v10  ;;  %s909_s23 = sshll.u32 %s1262_s13, 8  ;;  %s351_s25 = scalar_lea.vmem [#allocation7], %s888_s24 }
  0x3a   : > { %367 = vrot.lane.b32.xlu0 %v1335_v0, %s1183_s28  ;;  %v1383_v28 = vrot.slane %v358_v16, %v396_v9  ;;  %v1394_v34 = vrot.slane %v358_v16, %v404_v13  ;;  %s799_s26 = sshll.u32 %s351_s25, 4  ;;  %p1604_p12 = scmp.ne.s32.totalorder %s1594_s19, 0  ;;  %s800_s26 = int_to_ptr.vmem [resolvable:$true] %s799_s26 }
  0x3b   : > { %s1190_s13 = smov [#allocation7]  }
  0x3e   : > { %369 = vrot.lane.b32.xlu0 %v1339_v1, %s1183_s28 }
  0xac   : > { %v1343_v2 = vpop.permute.xlu0 %367 }
  0xad   : > { %v1347_v3 = vsel %vm371_vm0, 0.0, %v1343_v2 }
  0xae   : > { %412 = vrot.lane.b32.xlu1 %v1347_v3, %s1184_s29 }
  0xb0   : > { %v370_v4 = vpop.permute.xlu0 %369 }
  0xb1   : > { %v1353_v5 = vsel %vm371_vm0, %v1343_v2, %v370_v4  ;;  %v377_v6 = vsel %vm371_vm0, %v370_v4, 0.0 }
  0xb2   : > { %416 = vrot.lane.b32.xlu0 %v377_v6, %s1184_s29  ;;  %414 = vrot.lane.b32.xlu1 %v1353_v5, %s1184_s29  ;;  %v997_v43 = vpack.i.bf16 %v377_v6, %v1353_v5 }
  0xb6   : > { %382 = vrot.lane.b32.xlu0 %v1353_v5, %s1185_s14  ;;  %380 = vrot.lane.b32.xlu1 %v1347_v3, %s1185_s14 }
  0xba   : > { %493 = vrot.lane.b32.xlu0 %v1347_v3, %s1186_s16  ;;  %384 = vrot.lane.b32.xlu1 %v377_v6, %s1185_s14 }
 0x120   : > { %v413_v12 = vpop.permute.xlu1 %412 }
 0x124   : > { %v417_v17 = vpop.permute.xlu0 %416  ;;  %v415_v18 = vpop.permute.xlu1 %414 }
 0x125   : > { %v419_v20 = vsel %vm418_vm1, %v413_v12, %v415_v18  ;;  %v420_v21 = vsel %vm418_vm1, %v415_v18, %v417_v17  ;;  %v425_v25 = vsel %vm424_vm2, %v417_v17, 0.0 }
 0x126   : > { %v1375_v22 = vmul.f32 %v1366_v14, %v419_v20  ;;  %v1378_v23 = vmul.f32 %v1368_v15, %v420_v21  ;;  %v444_v32 = vmul.f32 %v1370_v19, %v425_v25 }
 0x128   : > { %v383_v26 = vpop.permute.xlu0 %382  ;;  %v381_v27 = vpop.permute.xlu1 %380  ;;  %v977_v29 = vpack.i.bf16 %v1378_v23, %v1375_v22  ;;  %v1002_v42 = vpack.i.bf16 %v444_v32, %v1378_v23  ;;  %v1007_v45 = vpack.i.bf16 %v1375_v22, %v1347_v3 }
 0x129   : > { %v387_v30 = vsel %vm386_vm3, %v381_v27, %v383_v26  ;;  %v392_v31 = vsel %vm386_vm3, 0.0, %v381_v27 }
 0x12a   : > { %v1391_v33 = vmul.f32 %v1380_v24, %v387_v30  ;;  %978 = vrot.lane.b32.xlu0 %v977_v29, %s1186_s16  ;;  %v1397_v35 = vmul.f32 %v1383_v28, %v392_v31 }
 0x12c   : > { %v385_v36 = vpop.permute.xlu1 %384  ;;  %v982_v37 = vpack.i.bf16 %v1391_v33, %v444_v32  ;;  %v992_v41 = vpack.i.bf16 %v1397_v35, %v377_v6  ;;  %v494_v49 = vpop.permute.xlu0 %493  ;;  %v514_v46 = vpack.c.bf16 %v1353_v5, %v1391_v33 }
 0x12d   : > { %v388_v38 = vsel %vm386_vm3, %v383_v26, %v385_v36 }
 0x12e   : > { %v411_v39 = vmul.f32 %v1394_v34, %v388_v38  ;;  %983 = vrot.lane.b32.xlu1 %v982_v37, %s1186_s16 }
 0x130   : > { %v987_v40 = vpack.i.bf16 %v1353_v5, %v411_v39  ;;  %v1012_v44 = vpack.i.bf16 %v411_v39, %v1391_v33 }
 0x132   : > { %988 = vrot.lane.b32.xlu0 %v987_v40, %s1186_s16  ;;  %993 = vrot.lane.b32.xlu1 %v992_v41, %s1186_s16 }
 0x136   : > { %1003 = vrot.lane.b32.xlu0 %v1002_v42, %s1187_s17  ;;  %998 = vrot.lane.b32.xlu1 %v997_v43, %s1187_s17 }
 0x13a   : > { %1013 = vrot.lane.b32.xlu0 %v1012_v44, %s1187_s17  ;;  %1008 = vrot.lane.b32.xlu1 %v1007_v45, %s1187_s17 }
 0x13e   : > { %448 = vrot.lane.b32.xlu1 %v1397_v35, %s1187_s17  ;;  %577 = vperm.xlu0 %1017, %v363_v47  }
 0x142   : > { %584 = vperm.xlu1 %1018, %v364_v48  }
 0x19c   : > { %v979_v50 = vpop.permute.xlu0 %978 }
 0x19d   : > { %v981_v51 = vunpack.i.h.bf16 %v979_v50  ;;  %v980_v52 = vunpack.i.l.bf16 %v979_v50 }
 0x19f   : > { %v509_v53 = vsel %vm488_vm4, %v980_v52, %v981_v51 }
 0x1a0   : > { %v984_v54 = vpop.permute.xlu1 %983  ;;  %v521_v56 = vpack.c.bf16 %v509_v53, %v509_v53 }
 0x1a1   : > { %v985_v55 = vunpack.i.l.bf16 %v984_v54  ;;  %v986_v58 = vunpack.i.h.bf16 %v984_v54 }
 0x1a2   : > { %v529_v6 = vsel %vm527_vm5, %v521_v56, 0 }
 0x1a3   : > { %v510_v57 = vsel %vm488_vm4, %v981_v51, %v985_v55 }
 0x1a4   : > { %v989_v59 = vpop.permute.xlu0 %988  ;;  %v994_v60 = vpop.permute.xlu1 %993  ;;  %v522_v61 = vpack.c.bf16 %v510_v57, %v510_v57 }
 0x1a5   : > { %v991_v62 = vunpack.i.h.bf16 %v989_v59  ;;  %v990_v63 = vunpack.i.l.bf16 %v989_v59  ;;  %v996_v3 = vunpack.i.h.bf16 %v994_v60  ;;  %v995_v4 = vunpack.i.l.bf16 %v994_v60 }
 0x1a6   : > { %891 = vmatprep.subr.msk.bf16.mxu0 %vm527_vm5, %v522_v61 }
 0x1a7   : > { %541 = vmatpush1.bf16.msra.mxu0 %v529_v6  ;;  %v490_v7 = vsel %vm488_vm4, %v986_v58, %v990_v63  ;;  %v500_v8 = vsel %vm488_vm4, %v991_v62, %v995_v4  ;;  %v489_v9 = vsel %vm488_vm4, %v996_v3, %v986_v58  ;;  %v499_v10 = vsel %vm488_vm4, %v494_v49, %v991_v62 }
 0x1a8   : > { %v1004_v11 = vpop.permute.xlu0 %1003  ;;  %v999_v12 = vpop.permute.xlu1 %998  ;;  %v520_v13 = vpack.c.bf16 %v500_v8, %v490_v7  ;;  %v519_v16 = vpack.c.bf16 %v499_v10, %v489_v9 }
 0x1a9   : > { %v1006_v17 = vunpack.i.h.bf16 %v1004_v11  ;;  %v1005_v18 = vunpack.i.l.bf16 %v1004_v11  ;;  %v1001_v20 = vunpack.i.h.bf16 %v999_v12  ;;  %v1000_v21 = vunpack.i.l.bf16 %v999_v12 }
 0x1aa   : > { %542 = vmatprep.subr.bf16.mxu0 %v520_v13 }
 0x1ab   : > { %543 = vmatpush1.bf16.msra.mxu0 %v519_v16  ;;  %v466_v25 = vsel %vm454_vm6, %v1000_v21, %v1001_v20  ;;  %v479_v26 = vsel %vm454_vm6, %v1005_v18, %v1006_v17 }
 0x1ac   : > { %v1014_v27 = vpop.permute.xlu0 %1013  ;;  %v1009_v29 = vpop.permute.xlu1 %1008  ;;  %v518_v30 = vpack.c.bf16 %v479_v26, %v466_v25 }
 0x1ad   : > { %v1016_v31 = vunpack.i.h.bf16 %v1014_v27  ;;  %v1015_v32 = vunpack.i.l.bf16 %v1014_v27  ;;  %v1011_v36 = vunpack.i.h.bf16 %v1009_v29  ;;  %v1010_v37 = vunpack.i.l.bf16 %v1009_v29  ;;  %v592_v27 = vld [vmem:[%s1589_s7] sm:$0xff] }
 0x1ae   : > { %544 = vmatprep.subr.bf16.mxu0 %v518_v30  ;;  %v593_v29 = vld [vmem:[%s1590_s8] sm:$0xff] }
 0x1af   : > { %v465_v38 = vsel %vm454_vm6, %v1010_v37, %v1000_v21  ;;  %v478_v39 = vsel %vm454_vm6, %v1011_v36, %v1005_v18  ;;  %v456_v40 = vsel %vm454_vm6, %v1015_v32, %v1016_v31 }
 0x1b0   : > { %v449_v41 = vpop.permute.xlu1 %448  ;;  %v517_v42 = vpack.c.bf16 %v478_v39, %v465_v38  ;;  %v516_v43 = vpack.c.bf16 %v456_v40, %v1378_v23  ;;  %v894_v23 = vpack.c.bf16 %v1343_v2, %v1397_v35 }
 0x1b1   : > { %v455_v44 = vsel %vm454_vm6, %v449_v41, %v1015_v32 }
 0x1b2   : > { %545 = vmatpush1.bf16.msra.mxu0 %v517_v42  ;;  %v515_v45 = vpack.c.bf16 %v455_v44, %v1375_v22  ;;  %v362_v22 = vld [vmem:[%s1585_s3] sm:$0xf] }
 0x1b3   : > { %546 = vmatprep.subr.bf16.mxu0 %v516_v43 }
 0x1b6   : > { %547 = vmatpush1.bf16.msra.mxu0 %v515_v45 }
 0x1b7   : > { %548 = vmatprep.subr.bf16.mxu0 %v514_v46 }
 0x1b9   : > { %v578_v5 = vpop.permute.xlu0 %577 }
 0x1ba   : > { %895 = vmatpush1.bf16.msk.msra.mxu0 %vm1443_vm9, %v894_v23 }
 0x1bd   : > { %896 = vmatmul.mubr.msk.bf16.vlgmr.msra.gmra.mxu0 %vm523_vm10, %v362_v22  ;;  %v585_v48 = vpop.permute.xlu1 %584 }
 0x27d   : > { %v568_v33 = vpop.f32.mrf.mxu0 }
 0x27e   : > { %v580_v49 = vmul.f32 %v578_v5, %v568_v33 }
 0x27f   : > { %v570_v50 = vpop.f32.mrf.mxu0 }
 0x280   : > { %v587_v51 = vadd.f32 %v585_v48, %v580_v49  ;;  %v581_v52 = vmul.f32 %v578_v5, %v570_v50 }
 0x281   : > { %v572_v53 = vpop.f32.mrf.mxu0 }
 0x282   : > { %v589_v54 = vmax.f32 %v587_v51, 0.0  ;;  %v588_v2 = vadd.f32 %v585_v48, %v581_v52 }
 0x283   : > { %v573_v35 = vpop.f32.mrf.mxu0 }
 0x284   : > { %v590_v55 = vmax.f32 %v588_v2, 0.0  ;;  %596 = vrot.lane.b32.xlu1 %v589_v54, %s1183_s28 }
 0x286   : > { %598 = vrot.lane.b32.xlu0 %v590_v55, %s1183_s28  ;;  %s797_s28 = scalar_lea.hbm %s1591_s9, %s909_s23 }
 0x2f6   : > { %v1457_v56 = vpop.permute.xlu1 %596 }
 0x2f7   : > { %v604_v57 = vsel %vm371_vm0, 0.0, %v1457_v56 }
 0x2f8   : > { %623 = vrot.lane.b32.xlu1 %v604_v57, %s1184_s29  ;;  %608 = vrot.lane.b32.xlu0 %v604_v57, %s1185_s14  ;;  %v599_v58 = vpop.permute.xlu0 %598 }
 0x2f9   : > { %v1465_v59 = vsel %vm371_vm0, %v1457_v56, %v599_v58  ;;  %v605_v60 = vsel %vm371_vm0, %v599_v58, 0.0 }
 0x2fc   : > { %627 = vrot.lane.b32.xlu1 %v605_v60, %s1184_s29  ;;  %625 = vrot.lane.b32.xlu0 %v1465_v59, %s1184_s29  ;;  %s785_s29 = scalar_lea.sflag [#allocation4], %s349_s22 }
 0x300   : > { %610 = vrot.lane.b32.xlu1 %v1465_v59, %s1185_s14  ;;  %612 = vrot.lane.b32.xlu0 %v605_v60, %s1185_s14  ;;  %s1111_s14 = scalar_lea.vmem %s800_s26, 256 }
 0x301   : > { %p1112_p10 = scmp.ne.s32.totalorder %s800_s26, %s1111_s14 }
 0x303   : > { %p1113_p4 = pnand %p1112_p10, %p1604_p12 }
 0x305   : > { %p1114_p7 = pneg %p1113_p4 }
 0x36a   : > { %v624_v61 = vpop.permute.xlu1 %623  ;;  %v609_v62 = vpop.permute.xlu0 %608 }
 0x36b   : > { %v619_v13 = vsel %vm386_vm3, 0.0, %v609_v62 }
 0x36e   : > { %v628_v63 = vpop.permute.xlu1 %627  ;;  %v626_v3 = vpop.permute.xlu0 %625 }
 0x36f   : > { %v629_v4 = vsel %vm418_vm1, %v624_v61, %v626_v3  ;;  %v630_v6 = vsel %vm418_vm1, %v626_v3, %v628_v63  ;;  %v634_v9 = vsel %vm424_vm2, %v628_v63, 0.0 }
 0x370   : > { %v1477_v7 = vmul.f32 %v629_v4, %v1366_v14  ;;  %v1480_v8 = vmul.f32 %v630_v6, %v1368_v15  ;;  %v637_v18 = vmul.f32 %v634_v9, %v1370_v19  ;;  %v1494_v15 = vmul.f32 %v619_v13, %v1383_v28 }
 0x372   : > { %v611_v10 = vpop.permute.xlu1 %610  ;;  %v613_v11 = vpop.permute.xlu0 %612  ;;  %v1019_v12 = vpack.i.bf16 %v1480_v8, %v1477_v7  ;;  %v1029_v25 = vpack.i.bf16 %v1494_v15, %v605_v60  ;;  %v1044_v28 = vpack.i.bf16 %v637_v18, %v1480_v8 }
 0x373   : > { %v614_v16 = vsel %vm386_vm3, %v609_v62, %v611_v10  ;;  %v615_v17 = vsel %vm386_vm3, %v611_v10, %v613_v11 }
 0x374   : > { %v1490_v14 = vmul.f32 %v614_v16, %v1380_v24  ;;  %1020 = vrot.lane.b32.xlu1 %v1019_v12, %s1186_s16  ;;  %v622_v20 = vmul.f32 %v615_v17, %v1394_v34  ;;  %v1034_v24 = vpack.i.bf16 %v605_v60, %v1465_v59  ;;  %v1049_v34 = vpack.i.bf16 %v1477_v7, %v604_v57 }
 0x376   : > { %v1024_v21 = vpack.i.bf16 %v1490_v14, %v637_v18  ;;  %v1039_v19 = vpack.i.bf16 %v1465_v59, %v622_v20  ;;  %v1054_v26 = vpack.i.bf16 %v622_v20, %v1490_v14 }
 0x378   : > { %1025 = vrot.lane.b32.xlu0 %v1024_v21, %s1186_s16  ;;  %684 = vrot.lane.b32.xlu1 %v604_v57, %s1186_s16 }
 0x37c   : > { %1030 = vrot.lane.b32.xlu0 %v1029_v25, %s1186_s16  ;;  %1040 = vrot.lane.b32.xlu1 %v1039_v19, %s1186_s16  ;;  %v705_v25 = vpack.c.bf16 %v1465_v59, %v1490_v14  ;;  %v900_v19 = vpack.c.bf16 %v1457_v56, %v1494_v15  ;;  %s1115_s16 = sshll.u32 %s1190_s13, 4  ;;  %s1116_s16 = int_to_ptr.vmem [resolvable:$false] %s1115_s16 }
 0x37d   : > { %p1118_p8 = scmp.lt.s32.totalorder %s800_s26, %s1116_s16 }
 0x380   : > { %1035 = vrot.lane.b32.xlu0 %v1034_v24, %s1187_s17  ;;  %1045 = vrot.lane.b32.xlu1 %v1044_v28, %s1187_s17 }
 0x384   : > { %1050 = vrot.lane.b32.xlu0 %v1049_v34, %s1187_s17  ;;  %1055 = vrot.lane.b32.xlu1 %v1054_v26, %s1187_s17 }
 0x388   : > { %641 = vrot.lane.b32.xlu0 %v1494_v15, %s1187_s17  ;;  %766 = vperm.xlu1 %1018, %v592_v27   ;;  %s1117_s17 = scalar_lea.vmem %s1116_s16, 512 }
 0x389   : > { %p1119_p11 = scmp.lt.s32.totalorder %s1117_s17, %s1111_s14 }
 0x38b   : > { %p1120_p0 = por %p1119_p11, %p1118_p8 }
 0x38c   : > { %773 = vperm.xlu0 %1017, %v593_v29  }
 0x38d   : > { %p1121_p1 = pnand %p1120_p0, %p1114_p7 }
 0x3e6   : > { %v1021_v30 = vpop.permute.xlu1 %1020 }
 0x3e7   : > { %v1023_v31 = vunpack.i.h.bf16 %v1021_v30  ;;  %v1022_v32 = vunpack.i.l.bf16 %v1021_v30 }
 0x3e9   : > { %v700_v36 = vsel %vm488_vm4, %v1022_v32, %v1023_v31 }
 0x3ea   : > { %v685_v37 = vpop.permute.xlu1 %684  ;;  %v1026_v38 = vpop.permute.xlu0 %1025  ;;  %v712_v40 = vpack.c.bf16 %v700_v36, %v700_v36 }
 0x3eb   : > { %v1027_v39 = vunpack.i.l.bf16 %v1026_v38  ;;  %v1028_v42 = vunpack.i.h.bf16 %v1026_v38 }
 0x3ec   : > { %v718_v33 = vsel %vm527_vm5, %v712_v40, 0 }
 0x3ed   : > { %v701_v41 = vsel %vm488_vm4, %v1023_v31, %v1027_v39 }
 0x3ee   : > { %v1041_v43 = vpop.permute.xlu1 %1040  ;;  %v1031_v44 = vpop.permute.xlu0 %1030  ;;  %v713_v45 = vpack.c.bf16 %v701_v41, %v701_v41 }
 0x3ef   : > { %v1043_v46 = vunpack.i.h.bf16 %v1041_v43  ;;  %v1042_v23 = vunpack.i.l.bf16 %v1041_v43  ;;  %v1033_v22 = vunpack.i.h.bf16 %v1031_v44  ;;  %v1032_v5 = vunpack.i.l.bf16 %v1031_v44 }
 0x3f0   : > { %897 = vmatprep.subr.msk.bf16.mxu1 %vm527_vm5, %v713_v45 }
 0x3f1   : > { %730 = vmatpush1.bf16.msra.mxu1 %v718_v33  ;;  %v681_v48 = vsel %vm488_vm4, %v1028_v42, %v1042_v23  ;;  %v691_v49 = vsel %vm488_vm4, %v1043_v46, %v1032_v5  ;;  %v680_v50 = vsel %vm488_vm4, %v1033_v22, %v1028_v42  ;;  %v690_v51 = vsel %vm488_vm4, %v685_v37, %v1043_v46 }
 0x3f2   : > { %v1046_v52 = vpop.permute.xlu1 %1045  ;;  %v1036_v53 = vpop.permute.xlu0 %1035  ;;  %v711_v54 = vpack.c.bf16 %v691_v49, %v681_v48  ;;  %v710_v2 = vpack.c.bf16 %v690_v51, %v680_v50 }
 0x3f3   : > { %v1048_v35 = vunpack.i.h.bf16 %v1046_v52  ;;  %v1047_v55 = vunpack.i.l.bf16 %v1046_v52  ;;  %v1038_v57 = vunpack.i.h.bf16 %v1036_v53  ;;  %v1037_v58 = vunpack.i.l.bf16 %v1036_v53 }
 0x3f4   : > { %731 = vmatprep.subr.bf16.mxu1 %v711_v54 }
 0x3f5   : > { %732 = vmatpush1.bf16.msra.mxu1 %v710_v2  ;;  %v658_v60 = vsel %vm454_vm6, %v1037_v58, %v1038_v57  ;;  %v671_v61 = vsel %vm454_vm6, %v1047_v55, %v1048_v35 }
 0x3f6   : > { %v1056_v62 = vpop.permute.xlu1 %1055  ;;  %v1051_v63 = vpop.permute.xlu0 %1050  ;;  %v709_v3 = vpack.c.bf16 %v671_v61, %v658_v60 }
 0x3f7   : > { %v1058_v4 = vunpack.i.h.bf16 %v1056_v62  ;;  %v1057_v6 = vunpack.i.l.bf16 %v1056_v62  ;;  %v1053_v9 = vunpack.i.h.bf16 %v1051_v63  ;;  %v1052_v10 = vunpack.i.l.bf16 %v1051_v63 }
 0x3f8   : > { %733 = vmatprep.subr.bf16.mxu1 %v709_v3 }
 0x3f9   : > { %v657_v11 = vsel %vm454_vm6, %v1052_v10, %v1037_v58  ;;  %v670_v12 = vsel %vm454_vm6, %v1053_v9, %v1047_v55  ;;  %v648_v13 = vsel %vm454_vm6, %v1057_v6, %v1058_v4 }
 0x3fa   : > { %v642_v16 = vpop.permute.xlu0 %641  ;;  %v708_v17 = vpack.c.bf16 %v670_v12, %v657_v11  ;;  %v707_v18 = vpack.c.bf16 %v648_v13, %v1480_v8  ;;  %v591_v8 = vld [vmem:[%s1588_s6] sm:$0xf] }
 0x3fb   : > { %v647_v20 = vsel %vm454_vm6, %v642_v16, %v1057_v6 }
 0x3fc   : > { %734 = vmatpush1.bf16.msra.mxu1 %v708_v17  ;;  %v706_v21 = vpack.c.bf16 %v647_v20, %v1477_v7 }
 0x3fd   : > { %735 = vmatprep.subr.bf16.mxu1 %v707_v18 }
 0x400   : > { %736 = vmatpush1.bf16.msra.mxu1 %v706_v21 }
 0x401   : > { %737 = vmatprep.subr.bf16.mxu1 %v705_v25 }
 0x403   : > { %v767_v7 = vpop.permute.xlu1 %766 }
 0x404   : > { %901 = vmatpush1.bf16.msk.msra.mxu1 %vm1443_vm9, %v900_v19 }
 0x407   : > { %902 = vmatmul.mubr.msk.bf16.vlgmr.msra.gmra.mxu1 %vm523_vm10, %v591_v8  ;;  %v774_v14 = vpop.permute.xlu0 %773 }
 0x4c7   : > { %v757_v24 = vpop.f32.mrf.mxu1 }
 0x4c8   : > { %v769_v59 = vmul.f32 %v767_v7, %v757_v24 }
 0x4c9   : > { %v759_v28 = vpop.f32.mrf.mxu1 }
 0x4ca   : > { %v776_v34 = vadd.f32 %v774_v14, %v769_v59  ;;  %v770_v26 = vmul.f32 %v767_v7, %v759_v28 }
 0x4cb   : > { %v761_v56 = vpop.f32.mrf.mxu1 }
 0x4cc   : > { %v778_v47 = vadd.f32 %v776_v34, %v1335_v0  ;;  %v777_v15 = vadd.f32 %v774_v14, %v770_v26 }
 0x4cd   : > { %v762_v27 = vpop.f32.mrf.mxu1 }
 0x4ce   : > { %v780_v29 = vmax.f32 %v778_v47, 0.0  ;;  %v779_v30 = vadd.f32 %v777_v15, %v1339_v1 }
 0x4d0   : > { %v781_v31 = vmax.f32 %v779_v30, 0.0  ;;  %782 = vst [vmem:[%s351_s25] sm:$0xff] %v780_v29 }
 0x4d2   : > { %783 = vst [vmem:[%s351_s25 + $0x8] sm:$0xff] %v781_v31 }
 0x4d3   : > { %1124 = shalt.err (!%p1121_p1)
}
 0x4d4   : > { %s1125_s24 = scalar_lea.hbm %s797_s28, 256  ;;  %s1129_s25 = scalar_lea.hbm %s1591_s9, 512 }
 0x4d5   : > { %p1126_p3 = scmp.ne.s32.totalorder %s797_s28, %s1125_s24  ;;  %p1130_p13 = scmp.lt.s32.totalorder %s797_s28, %s1591_s9 }
 0x4d6   : > { %p1131_p5 = scmp.lt.s32.totalorder %s1129_s25, %s1125_s24 }
 0x4d7   : > { %p1127_p2 = pnand %p1126_p3, %p1604_p12 }
 0x4d8   : > { %p1132_p6 = por %p1131_p5, %p1130_p13 }
 0x4d9   : > { %p1128_p9 = pneg %p1127_p2 }
 0x4db   : > { %p1133_p10 = pnand %p1132_p6, %p1128_p9 }
 0x4dd   : > { %1136 = shalt.err (!%p1133_p10)
}
 0x4de   : > { %918 = dma.vmem_to_hbm [thread:$0]  (%p1604_p12), %s800_s26, 256, %s797_s28, %s785_s29  }
 0x4df PF: > { %p935_p4 = scmp.ge.s32.totalorder %s1179_s12, 2  ;;  %s811_s14 = sand.u32 1, %s1167_s30  }
 0x4e0   : > { %p1605_p7 = scmp.ne.s32.totalorder %s1595_s20, 0  ;;  %s812_s13 = scalar_lea.sflag [#allocation4], %s811_s14 }
 0x4e2   : > { %p928_p8 = pnand %p935_p4, %p1605_p7 }
 0x4e4   : > { %p929_p11 = pneg %p928_p8 }
 0x4e6   : > { %1162 = dma.done.wait (%p929_p11), %s812_s13, 256  }
 0x4e7   : > { %1164 = vsyncadd (%p929_p11), %s812_s13, 4294967040  ;;  %p21_p0 = scmp.ge.s32.totalorder %s1266_s15, 4   ;;  %s1606_s30 = smov %s1171_s10 }
 0x4e8   : > { %s1607_s10 = smov %s1175_s11  ;;  %s1608_s11 = smov %s1277_s18 }
 0x4e9   : > { %s1609_s12 = smov %s1266_s15  ;;  %23 = sbr.rel (!%p21_p0) target bundleno = 5 (0x5), region = 100 }
 0x4ee   :  { %817 = vsyncpa [#allocation3], 1 }
 0x4ef   :  { %819 = vsyncpa [#allocation3 + $0x1], 1 }
 0x4f0   :  { %820 = vsyncpa [#allocation6], 1 }
 0x4f1   :  { %821 = vsyncpa [#allocation4], 1 }
 0x4f2   :  { %823 = vsyncpa [#allocation4 + $0x1], 1 }

</bundles_post_ra>
